<compile_context>
chip_gen: v5e
topology: v5e:2x2
jax: 0.10.0
libtpu: 0.0.40
codegen_flags: <defaults>
</compile_context>

<pallas_src>
import functools

import jax
import jax.numpy as jnp
from jax.experimental import pallas as pl
from jax.experimental.pallas import tpu as pltpu


def gru_updater_kernel(x_ref, h_ref, wx_ref, whzr_ref, whh_ref, b_ref, out_ref):
    dout = out_ref.shape[-1]
    mm_dtype = wx_ref.dtype          # matmul operand dtype is set by the weights

    h = h_ref[...]                   # (tile, Dout) f32, kept f32 for gate math
    x_mm = x_ref[...].astype(mm_dtype)
    h_mm = h.astype(mm_dtype)

    # X-side of all three gates in one MXU pass, biases folded in; f32 accum.
    pre = jnp.dot(x_mm, wx_ref[...], preferred_element_type=jnp.float32) + b_ref[...]
    # H-side of Z and R in one MXU pass.
    hw = jnp.dot(h_mm, whzr_ref[...], preferred_element_type=jnp.float32)

    z_pre = pre[:, :dout] + hw[:, :dout]
    r_pre = pre[:, dout:2 * dout] + hw[:, dout:]

    # sigmoid(x) == 0.5*(tanh(0.5*x) + 1): single EUP push per gate.
    z = 0.5 * (jnp.tanh(0.5 * z_pre) + 1.0)
    r = 0.5 * (jnp.tanh(0.5 * r_pre) + 1.0)

    rh = (r * h).astype(mm_dtype)
    h_tilde = jnp.tanh(
        pre[:, 2 * dout:]
        + jnp.dot(rh, whh_ref[...], preferred_element_type=jnp.float32))

    # z*h + (1-z)*h_tilde == h_tilde + z*(h - h_tilde)   (one fewer vmul)
    out_ref[...] = (h_tilde + z * (h - h_tilde)).astype(out_ref.dtype)


def _round_up(v, m):
    return -(-v // m) * m


@functools.partial(jax.jit,
                   static_argnames=("row_tile", "matmul_dtype", "donate_h_prev"))
def gru_updater(x, h_prev, w_z, b_z, w_r, b_r, w_h, b_h, *,
                row_tile=512, matmul_dtype=jnp.bfloat16, donate_h_prev=False):
    """x: (N, Din) f32, h_prev: (N, Dout) f32.
    w_*: torch-layout (Dout, Din+Dout), b_*: (Dout,)."""
    n, din = x.shape
    dout = h_prev.shape[1]

    # Split/transpose each Linear(cat(X,H)) weight into plain row-major halves.
    def split(w):
        w = jnp.asarray(w, jnp.float32)
        return w[:, :din].T, w[:, din:].T          # (Din, Dout), (Dout, Dout)

    wxz, whz = split(w_z)
    wxr, whr = split(w_r)
    wxh, whh = split(w_h)

    # Fuse gates along the output (lane) axis; whh stays separate (needs R*H).
    wx_all = jnp.concatenate([wxz, wxr, wxh], axis=1).astype(matmul_dtype)  # (Din, 3*Dout)
    wh_zr = jnp.concatenate([whz, whr], axis=1).astype(matmul_dtype)        # (Dout, 2*Dout)
    wh_h = whh.astype(matmul_dtype)                                         # (Dout, Dout)
    b_all = jnp.concatenate([jnp.asarray(b_z, jnp.float32),
                             jnp.asarray(b_r, jnp.float32),
                             jnp.asarray(b_h, jnp.float32)]).reshape(1, 3 * dout)

    x = jnp.asarray(x, jnp.float32)
    h_prev = jnp.asarray(h_prev, jnp.float32)

    # Row tile: big for DMA/step-overhead efficiency, but keep >= 2 grid steps
    # so both v7x TensorCores get work; multiple of 8 (sublane).
    half = -(-n // 2)
    tile = max(8, min(row_tile, _round_up(half, 8)))
    grid = (pl.cdiv(n, tile),)   # no jnp.pad: edge block handled by Pallas masking

    in_specs = [
        pl.BlockSpec((tile, din), lambda i: (i, 0)),
        pl.BlockSpec((tile, dout), lambda i: (i, 0)),
        pl.BlockSpec((din, 3 * dout), lambda i: (0, 0)),      # resident weights
        pl.BlockSpec((dout, 2 * dout), lambda i: (0, 0)),
        pl.BlockSpec((dout, dout), lambda i: (0, 0)),
        pl.BlockSpec((1, 3 * dout), lambda i: (0, 0)),
    ]
    out_spec = pl.BlockSpec((tile, dout), lambda i: (i, 0))

    mm_bytes = jnp.dtype(matmul_dtype).itemsize
    cost = pl.CostEstimate(
        flops=2 * n * dout * 3 * (din + dout),
        transcendentals=3 * n * dout,
        bytes_accessed=(4 * n * (din + 2 * dout)
                        + mm_bytes * (3 * din * dout + 3 * dout * dout)
                        + 4 * 3 * dout),
    )

    extra = {}
    if donate_h_prev:
        # Recurrent-loop regime: write H_out in place of H_prev.
        extra["input_output_aliases"] = {1: 0}

    out = pl.pallas_call(
        gru_updater_kernel,
        out_shape=jax.ShapeDtypeStruct((n, dout), jnp.float32),
        grid=grid,
        in_specs=in_specs,
        out_specs=out_spec,
        compiler_params=pltpu.CompilerParams(
            dimension_semantics=("parallel",),
            vmem_limit_bytes=48 * 1024 * 1024,
        ),
        cost_estimate=cost,
        **extra,
    )(x, h_prev, wx_all, wh_zr, wh_h, b_all)

    return out


def reference(x, h_prev, w_z, b_z, w_r, b_r, w_h, b_h):
    xh = jnp.concatenate([x, h_prev], axis=1)
    z = jax.nn.sigmoid(xh @ w_z.T + b_z)
    r = jax.nn.sigmoid(xh @ w_r.T + b_r)
    xrh = jnp.concatenate([x, r * h_prev], axis=1)
    h_tilde = jnp.tanh(xrh @ w_h.T + b_h)
    return z * h_prev + (1.0 - z) * h_tilde


if __name__ == "__main__":
    N = 256          # number of nodes
    DIN = 64         # dim_in  (node_feature width)
    DOUT = 128       # dim_out (node_states width) -- lane-dense output

    key = jax.random.PRNGKey(0)
    k_x, k_h, k_wz, k_bz, k_wr, k_br, k_wh, k_bh = jax.random.split(key, 8)

    x = jax.random.normal(k_x, (N, DIN), jnp.float32)
    h_prev = jax.random.normal(k_h, (N, DOUT), jnp.float32)

    # Torch-layout parameters (Linear(dim_in + dim_out, dim_out, bias=True)).
    scale = 0.1
    w_z = jax.random.normal(k_wz, (DOUT, DIN + DOUT), jnp.float32) * scale
    b_z = jax.random.normal(k_bz, (DOUT,), jnp.float32) * scale
    w_r = jax.random.normal(k_wr, (DOUT, DIN + DOUT), jnp.float32) * scale
    b_r = jax.random.normal(k_br, (DOUT,), jnp.float32) * scale
    w_h = jax.random.normal(k_wh, (DOUT, DIN + DOUT), jnp.float32) * scale
    b_h = jax.random.normal(k_bh, (DOUT,), jnp.float32) * scale

    ref = reference(x, h_prev, w_z, b_z, w_r, b_r, w_h, b_h)

    # Exact-semantics check: f32 matmul operands, tight tolerance.
    out_f32 = jax.block_until_ready(
        gru_updater(x, h_prev, w_z, b_z, w_r, b_r, w_h, b_h,
                    matmul_dtype=jnp.float32))
    assert out_f32.shape == (N, DOUT)
    assert jnp.allclose(out_f32, ref, atol=2e-5, rtol=2e-5), "f32 mismatch vs reference"

    # Performance path: bf16 MXU operands, f32 accumulation; relaxed tolerance.
    out_bf16 = jax.block_until_ready(
        gru_updater(x, h_prev, w_z, b_z, w_r, b_r, w_h, b_h))
    assert out_bf16.shape == (N, DOUT)
    assert jnp.allclose(out_bf16, ref, atol=1e-1, rtol=1e-1), "bf16 mismatch vs reference"

    print("KERNEL_OK")
</pallas_src>

<mosaic_0001>
module attributes {stable_mosaic.version = 11 : i64} {
  func.func @gru_updater_kernel(%arg0: i32, %arg1: memref<128x64xf32, #tpu.memory_space<vmem>>, %arg2: memref<128x128xf32, #tpu.memory_space<vmem>>, %arg3: memref<64x384xf32, #tpu.memory_space<vmem>>, %arg4: memref<128x256xf32, #tpu.memory_space<vmem>>, %arg5: memref<128x128xf32, #tpu.memory_space<vmem>>, %arg6: memref<1x384xf32, #tpu.memory_space<vmem>>, %arg7: memref<128x128xf32, #tpu.memory_space<vmem>>) attributes {dimension_semantics = [#tpu.dimension_semantics<parallel>], iteration_bounds = array<i64: 2>, scalar_prefetch = 0 : i64, scratch_operands = 0 : i64, tpu.core_type = #tpu.core_type<tc>, window_params = [{transform_indices = @transform_0, window_bounds = array<i64: 128, 64>}, {transform_indices = @transform_1, window_bounds = array<i64: 128, 128>}, {pipeline_mode = #tpu.pipeline_mode<synchronous>, transform_indices = @transform_2, window_bounds = array<i64: 64, 384>}, {pipeline_mode = #tpu.pipeline_mode<synchronous>, transform_indices = @transform_3, window_bounds = array<i64: 128, 256>}, {pipeline_mode = #tpu.pipeline_mode<synchronous>, transform_indices = @transform_4, window_bounds = array<i64: 128, 128>}, {pipeline_mode = #tpu.pipeline_mode<synchronous>, transform_indices = @transform_5, window_bounds = array<i64: 1, 384>}, {transform_indices = @transform_6, window_bounds = array<i64: 128, 128>}]} {
    %c0 = arith.constant 0 : index
    %c0_0 = arith.constant 0 : index
    %0 = vector.load %arg2[%c0, %c0_0] : memref<128x128xf32, #tpu.memory_space<vmem>>, vector<128x128xf32>
    %c0_1 = arith.constant 0 : index
    %c0_2 = arith.constant 0 : index
    %1 = vector.load %arg1[%c0_1, %c0_2] : memref<128x64xf32, #tpu.memory_space<vmem>>, vector<128x64xf32>
    %c0_3 = arith.constant 0 : index
    %c0_4 = arith.constant 0 : index
    %2 = vector.load %arg3[%c0_3, %c0_4] : memref<64x384xf32, #tpu.memory_space<vmem>>, vector<64x384xf32>
    %cst = arith.constant dense<0.000000e+00> : vector<128x384xf32>
    %3 = tpu.matmul %1, %2, %cst {dimension_numbers = #tpu.dot_dimension_numbers<[1], [0], [0], [1], [0, 0, 1, 1], [], []>} : vector<128x64xf32>, vector<64x384xf32>, vector<128x384xf32> -> vector<128x384xf32>
    %c0_5 = arith.constant 0 : index
    %c0_6 = arith.constant 0 : index
    %4 = vector.load %arg6[%c0_5, %c0_6] : memref<1x384xf32, #tpu.memory_space<vmem>>, vector<1x384xf32>
    %5 = vector.broadcast %4 : vector<1x384xf32> to vector<128x384xf32>
    %6 = arith.addf %3, %5 : vector<128x384xf32>
    %c0_7 = arith.constant 0 : index
    %c0_8 = arith.constant 0 : index
    %7 = vector.load %arg4[%c0_7, %c0_8] : memref<128x256xf32, #tpu.memory_space<vmem>>, vector<128x256xf32>
    %cst_9 = arith.constant dense<0.000000e+00> : vector<128x256xf32>
    %8 = tpu.matmul %0, %7, %cst_9 {dimension_numbers = #tpu.dot_dimension_numbers<[1], [0], [0], [1], [0, 0, 1, 1], [], []>} : vector<128x128xf32>, vector<128x256xf32>, vector<128x256xf32> -> vector<128x256xf32>
    %9 = vector.extract_strided_slice %6 {offsets = [0, 0], sizes = [128, 128], strides = [1, 1]} : vector<128x384xf32> to vector<128x128xf32>
    %10 = vector.extract_strided_slice %8 {offsets = [0, 0], sizes = [128, 128], strides = [1, 1]} : vector<128x256xf32> to vector<128x128xf32>
    %11 = arith.addf %9, %10 : vector<128x128xf32>
    %12 = vector.extract_strided_slice %6 {offsets = [0, 128], sizes = [128, 128], strides = [1, 1]} : vector<128x384xf32> to vector<128x128xf32>
    %13 = vector.extract_strided_slice %8 {offsets = [0, 128], sizes = [128, 128], strides = [1, 1]} : vector<128x256xf32> to vector<128x128xf32>
    %14 = arith.addf %12, %13 : vector<128x128xf32>
    %cst_10 = arith.constant 5.000000e-01 : f32
    %15 = vector.broadcast %cst_10 : f32 to vector<128x128xf32>
    %16 = arith.mulf %15, %11 : vector<128x128xf32>
    %17 = math.tanh %16 : vector<128x128xf32>
    %cst_11 = arith.constant 1.000000e+00 : f32
    %18 = vector.broadcast %cst_11 : f32 to vector<128x128xf32>
    %19 = arith.addf %17, %18 : vector<128x128xf32>
    %cst_12 = arith.constant 5.000000e-01 : f32
    %20 = vector.broadcast %cst_12 : f32 to vector<128x128xf32>
    %21 = arith.mulf %20, %19 : vector<128x128xf32>
    %cst_13 = arith.constant 5.000000e-01 : f32
    %22 = vector.broadcast %cst_13 : f32 to vector<128x128xf32>
    %23 = arith.mulf %22, %14 : vector<128x128xf32>
    %24 = math.tanh %23 : vector<128x128xf32>
    %cst_14 = arith.constant 1.000000e+00 : f32
    %25 = vector.broadcast %cst_14 : f32 to vector<128x128xf32>
    %26 = arith.addf %24, %25 : vector<128x128xf32>
    %cst_15 = arith.constant 5.000000e-01 : f32
    %27 = vector.broadcast %cst_15 : f32 to vector<128x128xf32>
    %28 = arith.mulf %27, %26 : vector<128x128xf32>
    %29 = arith.mulf %28, %0 : vector<128x128xf32>
    %30 = vector.extract_strided_slice %6 {offsets = [0, 256], sizes = [128, 128], strides = [1, 1]} : vector<128x384xf32> to vector<128x128xf32>
    %c0_16 = arith.constant 0 : index
    %c0_17 = arith.constant 0 : index
    %31 = vector.load %arg5[%c0_16, %c0_17] : memref<128x128xf32, #tpu.memory_space<vmem>>, vector<128x128xf32>
    %cst_18 = arith.constant dense<0.000000e+00> : vector<128x128xf32>
    %32 = tpu.matmul %29, %31, %cst_18 {dimension_numbers = #tpu.dot_dimension_numbers<[1], [0], [0], [1], [0, 0, 1, 1], [], []>} : vector<128x128xf32>, vector<128x128xf32>, vector<128x128xf32> -> vector<128x128xf32>
    %33 = arith.addf %30, %32 : vector<128x128xf32>
    %34 = math.tanh %33 : vector<128x128xf32>
    %35 = arith.subf %0, %34 : vector<128x128xf32>
    %36 = arith.mulf %21, %35 : vector<128x128xf32>
    %37 = arith.addf %34, %36 : vector<128x128xf32>
    %c0_19 = arith.constant 0 : index
    %c0_20 = arith.constant 0 : index
    %38 = vector.load %arg7[%c0_19, %c0_20] : memref<128x128xf32, #tpu.memory_space<vmem>>, vector<128x128xf32>
    tpu.vector_store %arg7[%c0_19, %c0_20], %37 {strides = array<i32>} : memref<128x128xf32, #tpu.memory_space<vmem>>, vector<128x128xf32>,
    return
  }
  func.func @transform_0(%arg0: i32) -> (i32, i32) {
    %c0_i32 = arith.constant 0 : i32
    %c0_i32_0 = arith.constant 0 : i32
    return %arg0, %c0_i32 : i32, i32
  }
  func.func @transform_1(%arg0: i32) -> (i32, i32) {
    %c0_i32 = arith.constant 0 : i32
    %c0_i32_0 = arith.constant 0 : i32
    return %arg0, %c0_i32 : i32, i32
  }
  func.func @transform_2(%arg0: i32) -> (i32, i32) {
    %c0_i32 = arith.constant 0 : i32
    %c0_i32_0 = arith.constant 0 : i32
    %c0_i32_1 = arith.constant 0 : i32
    return %c0_i32, %c0_i32_0 : i32, i32
  }
  func.func @transform_3(%arg0: i32) -> (i32, i32) {
    %c0_i32 = arith.constant 0 : i32
    %c0_i32_0 = arith.constant 0 : i32
    %c0_i32_1 = arith.constant 0 : i32
    return %c0_i32, %c0_i32_0 : i32, i32
  }
  func.func @transform_4(%arg0: i32) -> (i32, i32) {
    %c0_i32 = arith.constant 0 : i32
    %c0_i32_0 = arith.constant 0 : i32
    %c0_i32_1 = arith.constant 0 : i32
    return %c0_i32, %c0_i32_0 : i32, i32
  }
  func.func @transform_5(%arg0: i32) -> (i32, i32) {
    %c0_i32 = arith.constant 0 : i32
    %c0_i32_0 = arith.constant 0 : i32
    %c0_i32_1 = arith.constant 0 : i32
    return %c0_i32, %c0_i32_0 : i32, i32
  }
  func.func @transform_6(%arg0: i32) -> (i32, i32) {
    %c0_i32 = arith.constant 0 : i32
    %c0_i32_0 = arith.constant 0 : i32
    return %arg0, %c0_i32 : i32, i32
  }
}

</mosaic_0001>

<bundles_post_ra>
// kernel: gru_updater.1
= control target key start
LH: loop header
LB: loop body
LE: loop exit
PB: predicated region body
PF: predicated region fallthrough
CT: control target
= control target key end

     0   :  { %11 = vsyncpa [#allocation3], 0  ;;  %s2304_s0 = inlined_call_operand.vmem [shape: f32[256,64], index: 0, kind: input, shape index: {}]   ;;  %s2305_s1 = inlined_call_operand.vmem [shape: f32[256,128], index: 1, kind: input, shape index: {}]   ;;  %s2306_s2 = inlined_call_operand.vmem [shape: f32[64,384], index: 2, kind: input, shape index: {}]   ;;  %s2307_s3 = inlined_call_operand.vmem [shape: f32[128,256], index: 3, kind: input, shape index: {}]   ;;  %s2308_s4 = inlined_call_operand.vmem [shape: f32[128,128], index: 4, kind: input, shape index: {}]   ;;  %s2309_s5 = inlined_call_operand.vmem [shape: f32[1,384], index: 5, kind: input, shape index: {}]   ;;  %s2310_s6 = inlined_call_operand.hbm [shape: f32[256,128], index: 6, kind: output, shape index: {}]  }
   0x1   :  { %13 = vsyncpa [#allocation3 + $0x1], 0  ;;  %s1521_s21 = smov 0   ;;  %s1523_s22 = smov 0  }
   0x2   :  { %s1525_s23 = smov 0   ;;  %s1527_s24 = smov 0  }
   0x3 LB: > { %s1542_s25 = sadd.s32 4294967295, %s1482_s24   ;;  %s1188_s26 = sadd.s32 4294967294, %s1482_s24   ;;  %s1482_s24 = sphi %s1527_s24, %s2330_s24   ;;  %s1478_s23 = sphi %s1525_s23, %s2329_s23   ;;  %s1474_s22 = sphi %s1523_s22, %s2328_s22   ;;  %s1470_s21 = sphi %s1521_s21, %s2327_s21  }
   0x4   : > { %s1546_s27 = sadd.s32 1, %s1482_s24   ;;  %s162_s28 = sadd.s32 1, %s1478_s23 }
   0x5   : > { %s159_s29 = ssub.s32 %s1482_s24, %s1546_s27  ;;  %p172_p0 = scmp.ne.s32.totalorder %s1478_s23, %s1474_s22 }
   0x6   : > { %p160_p1 = scmp.eq.s32.totalorder %s159_s29, 0  ;;  %p173_p2 = scmp.eq.s32.totalorder %s1542_s25, 1 }
   0x7   : > { %p178_p3 = scmp.ne.s32.totalorder %s1474_s22, %s1470_s21  ;;  %p179_p4 = scmp.eq.s32.totalorder %s1188_s26, 1 }
   0x8   : > { %s1557_s30 = scalar_select %p160_p1, %s1478_s23, %s162_s28  }
   0x9   : > { %p1559_p5 = por %p173_p2, %p172_p0  ;;  %p1563_p6 = por %p179_p4, %p178_p3 }
   0xa   : > { %p1191_p7 = scmp.ge.s32.totalorder %s1482_s24, 1  ;;  %p227_p8 = scmp.lt.s32.totalorder %s1482_s24, 3 }
   0xc   : > { %p228_p9 = pnand %p1191_p7, %p227_p8 }
   0xe   : > { %231 = sbr.rel (%p228_p9) target bundleno = 515 (0x203), region = 44 }
  0x13   : > { %v328_v0 = vld [vmem:[%s2306_s2 + $0xa8] sm:$0xff]  ;;  %v329_v1 = vld [vmem:[%s2306_s2 + $0xb0] sm:$0xff]  ;;  %s1193_s15 = sshll.u32 %s1542_s25, 4  ;;  %v326_v3 = vld [vmem:[%s2306_s2 + $0x98] sm:$0xff]  ;;  %vm339_vm0 = vcmask 523264   ;;  %s1250_s29 = sshll.u32 %s1542_s25, 7 }
  0x14   : > { %v325_v2 = vld [vmem:[%s2306_s2 + $0x90] sm:$0xff]  ;;  %396 = vmatpush.msra.mxu0 %v328_v0  ;;  %1259 = vmatpush.msra.mxu3 %v329_v1  ;;  %p263_p10 = scmp.lt.s32.totalorder %s1193_s15, 31  ;;  %v322_v4 = vld [vmem:[%s2306_s2 + $0x78] sm:$0xff]  ;;  %v323_v5 = vld [vmem:[%s2306_s2 + $0x80] sm:$0xff]  ;;  %s1110_s11 = scalar_lea.hbm %s2310_s6, %s1250_s29 }
  0x15   : > { %1251 = vmatpush.msra.mxu2 %v328_v0  ;;  %461 = vmatpush.msra.mxu1 %v329_v1  ;;  %v319_v6 = vld [vmem:[%s2306_s2 + $0x60] sm:$0xff]  ;;  %v320_v7 = vld [vmem:[%s2306_s2 + $0x68] sm:$0xff]  ;;  %v317_v9 = vld [vmem:[%s2306_s2 + $0x50] sm:$0xff]  ;;  %s1113_s14 = sshll.u32 %s1110_s11, 4  ;;  %s1440_s19 = scalar_lea.hbm %s2310_s6, 256  ;;  %s1114_s14 = int_to_ptr.hbm [resolvable:$true] %s1113_s14 }
  0x16   : > { %397 = vmatpush.msra.mxu0 %v325_v2  ;;  %1260 = vmatpush.msra.mxu3 %v326_v3  ;;  %s2332_s15 = smov (!%p263_p10, %s1193_s15), 31  ;;  %v316_v8 = vld [vmem:[%s2306_s2 + $0x48] sm:$0xff]  ;;  %v313_v10 = vld [vmem:[%s2306_s2 + $0x30] sm:$0xff]  ;;  %v314_v11 = vld [vmem:[%s2306_s2 + $0x38] sm:$0xff] }
  0x17   : > { %1252 = vmatpush.msra.mxu2 %v325_v2  ;;  %462 = vmatpush.msra.mxu1 %v326_v3  ;;  %s1194_s16 = sshll.u32 %s2332_s15, 3  ;;  %v310_v12 = vld [vmem:[%s2306_s2 + $0x18] sm:$0xff]  ;;  %v311_v13 = vld [vmem:[%s2306_s2 + $0x20] sm:$0xff]  ;;  %v308_v15 = vld [vmem:[%s2306_s2 + $0x8] sm:$0xff]  ;;  %s1434_s15 = sshra.s32 %s1114_s14, 4  ;;  %s1435_s15 = int_to_ptr.hbm [resolvable:$true] %s1434_s15 }
  0x18   : > { %398 = vmatpush.msra.mxu0 %v322_v4  ;;  %1261 = vmatpush.msra.mxu3 %v323_v5  ;;  %s1620_s12 = scalar_lea.vmem %s2304_s0, %s1194_s16  ;;  %v307_v14 = vld [vmem:[%s2306_s2] sm:$0xff]  ;;  %v1637_v18 = vld [vmem:[%s2307_s3 + $0xf8] sm:$0xff]  ;;  %v1652_v21 = vld [vmem:[%s2307_s3 + $0xe8] sm:$0xff]  ;;  %s1896_s17 = scalar_lea.vmem %s2305_s1, %s1194_s16 }
  0x19   : > { %1253 = vmatpush.msra.mxu2 %v322_v4  ;;  %463 = vmatpush.msra.mxu1 %v323_v5  ;;  %v1629_v16 = vld [vmem:[%s1620_s12] sm:$0xff]  ;;  %v1640_v19 = vld [vmem:[%s1620_s12 + $0x48] sm:$0xff]  ;;  %v330_v20 = vld [vmem:[%s2306_s2 + $0xb8] sm:$0xff]  ;;  %s1436_s16 = scalar_lea.hbm %s1435_s15, 128  ;;  %p1441_p0 = scmp.lt.s32.totalorder %s1435_s15, %s2310_s6 }
  0x1a   : > { %399 = vmatpush.msra.mxu0 %v319_v6  ;;  %1262 = vmatpush.msra.mxu3 %v320_v7  ;;  %v1632_v17 = vld [vmem:[%s1620_s12 + $0x40] sm:$0xff]  ;;  %v613_v22 = vld [vmem:[%s2307_s3 + $0xf0] sm:$0xff]  ;;  %v1666_v24 = vld [vmem:[%s2307_s3 + $0xd8] sm:$0xff]  ;;  %p1437_p11 = scmp.ne.s32.totalorder %s1435_s15, %s1436_s16  ;;  %p1442_p1 = scmp.lt.s32.totalorder %s1440_s19, %s1436_s16 }
  0x1b   : > { %1254 = vmatpush.msra.mxu2 %v319_v6  ;;  %464 = vmatpush.msra.mxu1 %v320_v7  ;;  %v327_v23 = vld [vmem:[%s2306_s2 + $0xa0] sm:$0xff]  ;;  %v609_v26 = vld [vmem:[%s2307_s3 + $0xd0] sm:$0xff]  ;;  %v1678_v27 = vld [vmem:[%s2307_s3 + $0xc8] sm:$0xff] }
  0x1c   : > { %400 = vmatpush.msra.mxu0 %v316_v8  ;;  %1263 = vmatpush.msra.mxu3 %v317_v9  ;;  %v611_v25 = vld [vmem:[%s2307_s3 + $0xe0] sm:$0xff]  ;;  %v324_v28 = vld [vmem:[%s2306_s2 + $0x88] sm:$0xff]  ;;  %v1690_v30 = vld [vmem:[%s2307_s3 + $0xb8] sm:$0xff]  ;;  %p1438_p12 = pnand %p1437_p11, %p1559_p5  ;;  %p1443_p2 = por %p1442_p1, %p1441_p0 }
  0x1d   : > { %1255 = vmatpush.msra.mxu2 %v316_v8  ;;  %465 = vmatpush.msra.mxu1 %v317_v9  ;;  %v1684_v29 = vld [vmem:[%s1620_s12 + $0x8] sm:$0xff]  ;;  %v321_v31 = vld [vmem:[%s2306_s2 + $0x70] sm:$0xff]  ;;  %v607_v33 = vld [vmem:[%s2307_s3 + $0xc0] sm:$0xff] }
  0x1e   : > { %401 = vmatpush.msra.mxu0 %v313_v10  ;;  %1264 = vmatpush.msra.mxu3 %v314_v11  ;;  %v1698_v32 = vld [vmem:[%s1620_s12 + $0x50] sm:$0xff]  ;;  %v1711_v34 = vld [vmem:[%s2307_s3 + $0xa8] sm:$0xff]  ;;  %v318_v35 = vld [vmem:[%s2306_s2 + $0x58] sm:$0xff]  ;;  %p1439_p13 = pneg %p1438_p12 }
  0x1f   : > { %1256 = vmatpush.msra.mxu2 %v313_v10  ;;  %466 = vmatpush.msra.mxu1 %v314_v11  ;;  %v605_v36 = vld [vmem:[%s2307_s3 + $0xb0] sm:$0xff]  ;;  %v1725_v37 = vld [vmem:[%s2307_s3 + $0x98] sm:$0xff]  ;;  %v315_v38 = vld [vmem:[%s2306_s2 + $0x40] sm:$0xff] }
  0x20   : > { %402 = vmatpush.msra.mxu0 %v310_v12  ;;  %1265 = vmatpush.msra.mxu3 %v311_v13  ;;  %v603_v39 = vld [vmem:[%s2307_s3 + $0xa0] sm:$0xff]  ;;  %v1737_v40 = vld [vmem:[%s2307_s3 + $0x88] sm:$0xff]  ;;  %v1743_v42 = vld [vmem:[%s1620_s12 + $0x10] sm:$0xff]  ;;  %p1444_p3 = pnand %p1443_p2, %p1439_p13 }
  0x21   : > { %1257 = vmatpush.msra.mxu2 %v310_v12  ;;  %467 = vmatpush.msra.mxu1 %v311_v13  ;;  %v312_v41 = vld [vmem:[%s2306_s2 + $0x28] sm:$0xff]  ;;  %v1749_v43 = vld [vmem:[%s2307_s3 + $0x78] sm:$0xff]  ;;  %v601_v44 = vld [vmem:[%s2307_s3 + $0x90] sm:$0xff] }
  0x22   : > { %403 = vmatpush.msra.mxu0 %v307_v14  ;;  %1266 = vmatpush.msra.mxu3 %v308_v15  ;;  %v1757_v45 = vld [vmem:[%s1620_s12 + $0x58] sm:$0xff]  ;;  %v1767_v46 = vld [vmem:[%s2307_s3 + $0x68] sm:$0xff]  ;;  %v599_v47 = vld [vmem:[%s2307_s3 + $0x80] sm:$0xff] }
  0x23   : > { %1197 = vmatmul.msk.f32.vlgmr.msra.gmra.mxu0 %vm339_vm0, %v1629_v16  ;;  %1221 = vmatmul.msk.f32.vlgmr.msra.gmra.mxu3 %vm339_vm0, %v1632_v17  ;;  %v1778_v48 = vld [vmem:[%s2307_s3 + $0x58] sm:$0xff]  ;;  %v597_v49 = vld [vmem:[%s2307_s3 + $0x70] sm:$0xff]  ;;  %v592_v51 = vld [vmem:[%s2307_s3 + $0x48] sm:$0xff] }
  0x24   : > { %680 = vmatpush.msrb.mxu0 %v1637_v18  ;;  %1258 = vmatpush.msra.mxu2 %v307_v14  ;;  %v309_v50 = vld [vmem:[%s2306_s2 + $0x10] sm:$0xff]  ;;  %v595_v52 = vld [vmem:[%s2307_s3 + $0x60] sm:$0xff]  ;;  %v1794_v53 = vld [vmem:[%s1620_s12 + $0x18] sm:$0xff] }
  0x25   : > { %1206 = vmatmul.msk.f32.vlgmr.msra.gmra.mxu2 %vm339_vm0, %v1640_v19  ;;  %615 = vmatpush.msrb.mxu3 %v613_v22  ;;  %v593_v54 = vld [vmem:[%s2307_s3 + $0x50] sm:$0xff]  ;;  %v590_v55 = vld [vmem:[%s2307_s3 + $0x38] sm:$0xff]  ;;  %v1807_v56 = vld [vmem:[%s1620_s12 + $0x60] sm:$0xff] }
  0x26   : > { %526 = vmatpush.msrb.mxu2 %v330_v20  ;;  %681 = vmatpush.msrb.mxu0 %v1652_v21  ;;  %v591_v57 = vld [vmem:[%s2307_s3 + $0x40] sm:$0xff]  ;;  %v589_v58 = vld [vmem:[%s2307_s3 + $0x30] sm:$0xff]  ;;  %v588_v59 = vld [vmem:[%s2307_s3 + $0x28] sm:$0xff] }
  0x27   : > { %616 = vmatpush.msrb.mxu3 %v611_v25  ;;  %468 = vmatpush.msra.mxu1 %v308_v15  ;;  %v586_v60 = vld [vmem:[%s2307_s3 + $0x18] sm:$0xff]  ;;  %v587_v61 = vld [vmem:[%s2307_s3 + $0x20] sm:$0xff]  ;;  %v585_v63 = vld [vmem:[%s2307_s3 + $0x10] sm:$0xff] }
  0x28   : > { %527 = vmatpush.msrb.mxu2 %v327_v23  ;;  %682 = vmatpush.msrb.mxu0 %v1666_v24  ;;  %v1832_v62 = vld [vmem:[%s1620_s12 + $0x20] sm:$0xff]  ;;  %v1841_v0 = vld [vmem:[%s1620_s12 + $0x68] sm:$0xff]  ;;  %v1862_v4 = vld [vmem:[%s1620_s12 + $0x70] sm:$0xff] }
  0x29   : > { %617 = vmatpush.msrb.mxu3 %v609_v26  ;;  %1213 = vmatmul.msk.f32.vlgmr.msra.gmra.mxu1 %vm339_vm0, %v1629_v16  ;;  %v583_v1 = vld [vmem:[%s2307_s3] sm:$0xff]  ;;  %v584_v2 = vld [vmem:[%s2307_s3 + $0x8] sm:$0xff]  ;;  %v297_v5 = vld [vmem:[%s1620_s12 + $0x30] sm:$0xff] }
  0x2a   : > { %683 = vmatpush.msrb.mxu0 %v1678_v27  ;;  %528 = vmatpush.msrb.mxu2 %v324_v28  ;;  %v296_v3 = vld [vmem:[%s1620_s12 + $0x28] sm:$0xff]  ;;  %v1875_v6 = vld [vmem:[%s1620_s12 + $0x78] sm:$0xff]  ;;  %v1899_v8 = vld [vmem:[%s1896_s17] sm:$0xff] }
  0x2b   : > { %1198 = vmatmul.msk.f32.gmra.mxu0 %vm339_vm0, %v1684_v29  ;;  %1222 = vmatmul.msk.f32.gmra.mxu3 %vm339_vm0, %v1640_v19  ;;  %v298_v7 = vld [vmem:[%s1620_s12 + $0x38] sm:$0xff]  ;;  %v1908_v9 = vld [vmem:[%s1896_s17 + $0x8] sm:$0xff]  ;;  %v1915_v10 = vld [vmem:[%s1896_s17 + $0x10] sm:$0xff] }
  0x2c   : > { %684 = vmatpush.msrb.mxu0 %v1690_v30  ;;  %529 = vmatpush.msrb.mxu2 %v321_v31  ;;  %v1922_v11 = vld [vmem:[%s1896_s17 + $0x18] sm:$0xff]  ;;  %v1929_v12 = vld [vmem:[%s1896_s17 + $0x20] sm:$0xff]  ;;  %v1935_v13 = vld [vmem:[%s1896_s17 + $0x28] sm:$0xff] }
  0x2d   : > { %1207 = vmatmul.msk.f32.gmra.mxu2 %vm339_vm0, %v1698_v32  ;;  %618 = vmatpush.msrb.mxu3 %v607_v33  ;;  %v1941_v14 = vld [vmem:[%s1896_s17 + $0x30] sm:$0xff]  ;;  %v1947_v15 = vld [vmem:[%s1896_s17 + $0x38] sm:$0xff]  ;;  %v934_v22 = vld [vmem:[%s2308_s4 + $0x68] sm:$0xff] }
  0x2e   : > { %685 = vmatpush.msrb.mxu0 %v1711_v34  ;;  %530 = vmatpush.msrb.mxu2 %v318_v35  ;;  %v2003_v33 = vld [vmem:[%s1896_s17 + $0x50] sm:$0xff]  ;;  %v930_v35 = vld [vmem:[%s2308_s4 + $0x48] sm:$0xff] }
  0x2f   : > { %619 = vmatpush.msrb.mxu3 %v605_v36 }
  0x30   : > { %686 = vmatpush.msrb.mxu0 %v1725_v37  ;;  %531 = vmatpush.msrb.mxu2 %v315_v38  ;;  %v2021_v38 = vld [vmem:[%s1896_s17 + $0x58] sm:$0xff] }
  0x31   : > { %620 = vmatpush.msrb.mxu3 %v603_v39  ;;  %1214 = vmatmul.msk.f32.gmra.mxu1 %vm339_vm0, %v1684_v29 }
  0x32   : > { %687 = vmatpush.msrb.mxu0 %v1737_v40  ;;  %532 = vmatpush.msrb.mxu2 %v312_v41  ;;  %v927_v41 = vld [vmem:[%s2308_s4 + $0x30] sm:$0xff] }
  0x33   : > { %1199 = vmatmul.msk.f32.gmra.mxu0 %vm339_vm0, %v1743_v42  ;;  %1223 = vmatmul.msk.f32.gmra.mxu3 %vm339_vm0, %v1698_v32 }
  0x34   : > { %688 = vmatpush.msrb.mxu0 %v1749_v43  ;;  %621 = vmatpush.msrb.mxu3 %v601_v44  ;;  %v2039_v44 = vld [vmem:[%s1896_s17 + $0x60] sm:$0xff] }
  0x35   : > { %1208 = vmatmul.msk.f32.gmra.mxu2 %vm339_vm0, %v1757_v45 }
  0x36   : > { %689 = vmatpush.msrb.mxu0 %v1767_v46  ;;  %622 = vmatpush.msrb.mxu3 %v599_v47 }
  0x37   : > { %533 = vmatpush.msrb.mxu2 %v309_v50 }
  0x38   : > { %690 = vmatpush.msrb.mxu0 %v1778_v48  ;;  %623 = vmatpush.msrb.mxu3 %v597_v49  ;;  %v2054_v49 = vld [vmem:[%s1896_s17 + $0x68] sm:$0xff] }
  0x39   : > { %1267 = vmatpush.msra.mxu2 %v1637_v18  ;;  %1215 = vmatmul.msk.f32.gmra.mxu1 %vm339_vm0, %v1743_v42  ;;  %v935_v18 = vld [vmem:[%s2308_s4 + $0x70] sm:$0xff] }
  0x3a   : > { %691 = vmatpush.msrb.mxu0 %v592_v51  ;;  %624 = vmatpush.msrb.mxu3 %v595_v52 }
  0x3b   : > { %1200 = vmatmul.msk.f32.gmra.mxu0 %vm339_vm0, %v1794_v53  ;;  %1224 = vmatmul.msk.f32.gmra.mxu3 %vm339_vm0, %v1757_v45 }
  0x3c   : > { %625 = vmatpush.msrb.mxu3 %v593_v54  ;;  %692 = vmatpush.msrb.mxu0 %v590_v55  ;;  %v925_v54 = vld [vmem:[%s2308_s4 + $0x20] sm:$0xff] }
  0x3d   : > { %1209 = vmatmul.msk.f32.gmra.mxu2 %vm339_vm0, %v1807_v56 }
  0x3e   : > { %626 = vmatpush.msrb.mxu3 %v591_v57  ;;  %693 = vmatpush.msrb.mxu0 %v588_v59 }
  0x3f   : > { %1268 = vmatpush.msra.mxu2 %v1652_v21  ;;  %v1962_v21 = vld [vmem:[%s1896_s17 + $0x40] sm:$0xff] }
  0x40   : > { %627 = vmatpush.msrb.mxu3 %v589_v58  ;;  %694 = vmatpush.msrb.mxu0 %v586_v60  ;;  %v923_v58 = vld [vmem:[%s2308_s4 + $0x10] sm:$0xff] }
  0x41   : > { %1269 = vmatpush.msra.mxu2 %v1666_v24  ;;  %1216 = vmatmul.msk.f32.gmra.mxu1 %vm339_vm0, %v1794_v53  ;;  %v933_v24 = vld [vmem:[%s2308_s4 + $0x60] sm:$0xff] }
  0x42   : > { %628 = vmatpush.msrb.mxu3 %v587_v61  ;;  %695 = vmatpush.msrb.mxu0 %v584_v2 }
  0x43   : > { %1201 = vmatmul.msk.f32.gmra.mxu0 %vm339_vm0, %v1832_v62  ;;  %1225 = vmatmul.msk.f32.gmra.mxu3 %vm339_vm0, %v1807_v56 }
  0x44   : > { %629 = vmatpush.msrb.mxu3 %v585_v63  ;;  %1270 = vmatpush.msra.mxu2 %v1678_v27  ;;  %v1985_v27 = vld [vmem:[%s1896_s17 + $0x48] sm:$0xff]  ;;  %v921_v63 = vld [vmem:[%s2308_s4] sm:$0xff] }
  0x45   : > { %1210 = vmatmul.msk.f32.gmra.mxu2 %vm339_vm0, %v1841_v0 }
  0x46   : > { %630 = vmatpush.msrb.mxu3 %v583_v1  ;;  %1271 = vmatpush.msra.mxu2 %v1690_v30 }
  0x48   : > { %1272 = vmatpush.msra.mxu2 %v1711_v34 }
  0x49   : > { %1217 = vmatmul.msk.f32.gmra.mxu1 %vm339_vm0, %v1832_v62 }
  0x4a   : > { %1273 = vmatpush.msra.mxu2 %v1725_v37 }
  0x4b   : > { %1202 = vmatmul.msk.f32.gmra.mxu0 %vm339_vm0, %v296_v3  ;;  %1226 = vmatmul.msk.f32.gmra.mxu3 %vm339_vm0, %v1841_v0 }
  0x4c   : > { %1274 = vmatpush.msra.mxu2 %v1737_v40  ;;  %v928_v40 = vld [vmem:[%s2308_s4 + $0x38] sm:$0xff] }
  0x4d   : > { %1211 = vmatmul.msk.f32.gmra.mxu2 %vm339_vm0, %v1862_v4 }
  0x4e   : > { %1275 = vmatpush.msra.mxu2 %v1749_v43 }
  0x50   : > { %1276 = vmatpush.msra.mxu2 %v1767_v46  ;;  %v926_v46 = vld [vmem:[%s2308_s4 + $0x28] sm:$0xff] }
  0x51   : > { %1218 = vmatmul.msk.f32.gmra.mxu1 %vm339_vm0, %v296_v3 }
  0x52   : > { %1277 = vmatpush.msra.mxu2 %v1778_v48 }
  0x53   : > { %1203 = vmatmul.msk.f32.gmra.mxu0 %vm339_vm0, %v297_v5  ;;  %1227 = vmatmul.msk.f32.gmra.mxu3 %vm339_vm0, %v1862_v4 }
  0x54   : > { %1278 = vmatpush.msra.mxu2 %v592_v51 }
  0x55   : > { %1212 = vmatmul.msk.f32.gmra.mxu2 %vm339_vm0, %v1875_v6 }
  0x56   : > { %1279 = vmatpush.msra.mxu2 %v590_v55 }
  0x58   : > { %1280 = vmatpush.msra.mxu2 %v588_v59  ;;  %v922_v59 = vld [vmem:[%s2308_s4 + $0x8] sm:$0xff] }
  0x59   : > { %1219 = vmatmul.msk.f32.gmra.mxu1 %vm339_vm0, %v297_v5 }
  0x5a   : > { %1281 = vmatpush.msra.mxu2 %v586_v60 }
  0x5b   : > { %1204 = vmatmul.msk.f32.gmra.mxu0 %vm339_vm0, %v298_v7  ;;  %1228 = vmatmul.msk.f32.gmra.mxu3 %vm339_vm0, %v1875_v6 }
  0x5c   : > { %1282 = vmatpush.msra.mxu2 %v584_v2 }
  0x5d   : > { %1229 = vmatmul.msk.f32.vlgmr.msrb.gmra.mxu2 %vm339_vm0, %v1629_v16  ;;  %v936_v16 = vld [vmem:[%s2308_s4 + $0x78] sm:$0xff] }
  0x5e   : > { %937 = vmatpush.msrb.mxu1 %v936_v16 }
  0x60   : > { %938 = vmatpush.msrb.mxu1 %v935_v18 }
  0x61   : > { %1220 = vmatmul.msk.f32.gmra.mxu1 %vm339_vm0, %v298_v7 }
  0x62   : > { %939 = vmatpush.msrb.mxu1 %v934_v22 }
  0x63   : > { %1205 = vmatmul.msk.f32.gmra.mxu0 %vm339_vm0, %v1632_v17  ;;  %631 = vmatmul.f32.vlgmr.msrb.gmra.mxu3 %v1899_v8 }
  0x64   : > { %940 = vmatpush.msrb.mxu1 %v933_v24 }
  0x65   : > { %1230 = vmatmul.msk.f32.gmra.mxu2 %vm339_vm0, %v1684_v29  ;;  %v931_v29 = vld [vmem:[%s2308_s4 + $0x50] sm:$0xff] }
  0x6b   : > { %634 = vmatmul.f32.gmra.mxu3 %v1908_v9  ;;  %696 = vmatmul.f32.vlgmr.msrb.gmra.mxu0 %v1899_v8 }
  0x6d   : > { %1231 = vmatmul.msk.f32.gmra.mxu2 %vm339_vm0, %v1743_v42 }
  0x73   : > { %637 = vmatmul.f32.gmra.mxu3 %v1915_v10  ;;  %699 = vmatmul.f32.gmra.mxu0 %v1908_v9 }
  0x75   : > { %1232 = vmatmul.msk.f32.gmra.mxu2 %vm339_vm0, %v1794_v53  ;;  %v2066_v53 = vld [vmem:[%s1896_s17 + $0x70] sm:$0xff] }
  0x7b   : > { %640 = vmatmul.f32.gmra.mxu3 %v1922_v11  ;;  %702 = vmatmul.f32.gmra.mxu0 %v1915_v10 }
  0x7d   : > { %1233 = vmatmul.msk.f32.gmra.mxu2 %vm339_vm0, %v1832_v62  ;;  %v2090_v62 = vld [vmem:[%s1896_s17 + $0x78] sm:$0xff]  ;;  %s259_s17 = sand.u32 1, %s1474_s22  }
  0x7e   : > { %s1192_s26 = sshll.u32 %s259_s17, 7  ;;  %s1099_s25 = scalar_lea.sflag [#allocation3], %s259_s17 }
  0x7f   : > { %s2195_s28 = scalar_lea.vmem [#allocation2], %s1192_s26 }
  0x80   : > { %s1111_s13 = sshll.u32 %s2195_s28, 4  ;;  %s1112_s13 = int_to_ptr.vmem [resolvable:$true] %s1111_s13 }
  0x83   : > { %643 = vmatmul.f32.gmra.mxu3 %v1929_v12  ;;  %705 = vmatmul.f32.gmra.mxu0 %v1922_v11 }
  0x85   : > { %1234 = vmatmul.msk.f32.gmra.mxu2 %vm339_vm0, %v296_v3 }
  0x8b   : > { %646 = vmatmul.f32.gmra.mxu3 %v1935_v13  ;;  %708 = vmatmul.f32.gmra.mxu0 %v1929_v12 }
  0x8d   : > { %1235 = vmatmul.msk.f32.gmra.mxu2 %vm339_vm0, %v297_v5 }
  0x93   : > { %649 = vmatmul.f32.gmra.mxu3 %v1941_v14  ;;  %711 = vmatmul.f32.gmra.mxu0 %v1935_v13 }
  0x95   : > { %1236 = vmatmul.msk.f32.gmra.mxu2 %vm339_vm0, %v298_v7 }
  0x9b   : > { %652 = vmatmul.f32.gmra.mxu3 %v1947_v15  ;;  %714 = vmatmul.f32.gmra.mxu0 %v1941_v14 }
  0x9d   : > { %1237 = vmatmul.msk.f32.gmra.mxu2 %vm339_vm0, %v1632_v17  ;;  %v1972_v17 = vld [vmem:[%s2309_s5] sm:$0x7] }
  0x9e   : > { %v1977_v23 = vperm.slane %v1972_v17, 0 }
  0xa0   : > { %v1959_v20 = vpop.f32.mrf.mxu0 }
  0xa3   : > { %655 = vmatmul.f32.gmra.mxu3 %v1962_v21  ;;  %717 = vmatmul.f32.gmra.mxu0 %v1947_v15 }
  0xa5   : > { %1238 = vmatmul.msk.f32.gmra.mxu2 %vm339_vm0, %v1640_v19  ;;  %v932_v19 = vld [vmem:[%s2308_s4 + $0x58] sm:$0xff] }
  0xa6   : > { %941 = vmatpush.msrb.mxu1 %v932_v19  ;;  %v470_v57 = vpop.f32.mrf.mxu1 }
  0xa8   : > { %v1982_v25 = vpop.f32.mrf.mxu0  ;;  %v432_v26 = vpop.f32.mrf.mxu2  ;;  %942 = vmatpush.msrb.mxu1 %v931_v29 }
  0xa9   : > { %v1988_v28 = vadd.f32 %v432_v26, %v1977_v23 }
  0xaa   : > { %943 = vmatpush.msrb.mxu1 %v930_v35 }
  0xab   : > { %658 = vmatmul.f32.gmra.mxu3 %v1985_v27  ;;  %720 = vmatmul.f32.gmra.mxu0 %v1962_v21 }
  0xad   : > { %1239 = vmatmul.msk.f32.gmra.mxu2 %vm339_vm0, %v1698_v32  ;;  %v929_v32 = vld [vmem:[%s2308_s4 + $0x40] sm:$0xff] }
  0xae   : > { %944 = vmatpush.msrb.mxu1 %v929_v32  ;;  %v473_v1 = vpop.f32.mrf.mxu1 }
  0xb0   : > { %v2000_v30 = vpop.f32.mrf.mxu0  ;;  %v435_v31 = vpop.f32.mrf.mxu2  ;;  %945 = vmatpush.msrb.mxu1 %v928_v40 }
  0xb1   : > { %v2006_v34 = vadd.f32 %v435_v31, %v1977_v23 }
  0xb2   : > { %946 = vmatpush.msrb.mxu1 %v927_v41 }
  0xb3   : > { %661 = vmatmul.f32.gmra.mxu3 %v2003_v33  ;;  %723 = vmatmul.f32.gmra.mxu0 %v1985_v27 }
  0xb4   : > { %947 = vmatpush.msrb.mxu1 %v926_v46 }
  0xb5   : > { %1240 = vmatmul.msk.f32.gmra.mxu2 %vm339_vm0, %v1757_v45 }
  0xb6   : > { %948 = vmatpush.msrb.mxu1 %v925_v54  ;;  %v476_v7 = vpop.f32.mrf.mxu1 }
  0xb8   : > { %v2018_v36 = vpop.f32.mrf.mxu0  ;;  %v438_v37 = vpop.f32.mrf.mxu2 }
  0xb9   : > { %v2024_v39 = vadd.f32 %v438_v37, %v1977_v23 }
  0xbb   : > { %664 = vmatmul.f32.gmra.mxu3 %v2021_v38  ;;  %726 = vmatmul.f32.gmra.mxu0 %v2003_v33 }
  0xbd   : > { %1241 = vmatmul.msk.f32.gmra.mxu2 %vm339_vm0, %v1807_v56  ;;  %v924_v56 = vld [vmem:[%s2308_s4 + $0x18] sm:$0xff] }
  0xbe   : > { %949 = vmatpush.msrb.mxu1 %v924_v56  ;;  %v479_v35 = vpop.f32.mrf.mxu1 }
  0xc0   : > { %v2036_v42 = vpop.f32.mrf.mxu0  ;;  %v441_v43 = vpop.f32.mrf.mxu2  ;;  %950 = vmatpush.msrb.mxu1 %v923_v58 }
  0xc1   : > { %v2042_v45 = vadd.f32 %v441_v43, %v1977_v23 }
  0xc2   : > { %951 = vmatpush.msrb.mxu1 %v922_v59 }
  0xc3   : > { %667 = vmatmul.f32.gmra.mxu3 %v2039_v44  ;;  %729 = vmatmul.f32.gmra.mxu0 %v2021_v38 }
  0xc4   : > { %952 = vmatpush.msrb.mxu1 %v921_v63 }
  0xc5   : > { %1242 = vmatmul.msk.f32.gmra.mxu2 %vm339_vm0, %v1841_v0 }
  0xc6   : > { %v482_v59 = vpop.f32.mrf.mxu1 }
  0xc8   : > { %v2051_v47 = vpop.f32.mrf.mxu0  ;;  %v444_v48 = vpop.f32.mrf.mxu2 }
  0xc9   : > { %v2057_v50 = vadd.f32 %v444_v48, %v1977_v23 }
  0xcb   : > { %2313 = vst [vmem:[#allocation5_spill] sm:$0xff] %v2057_v50  ;;  %670 = vmatmul.f32.gmra.mxu3 %v2054_v49  ;;  %732 = vmatmul.f32.gmra.mxu0 %v2039_v44 }
  0xcd   : > { %1243 = vmatmul.msk.f32.gmra.mxu2 %vm339_vm0, %v1862_v4  ;;  %v2104_v4 = vperm.slane %v1972_v17, 1 }
  0xcf   : > { %v474_v26 = vadd.f32 %v473_v1, %v2104_v4  ;;  %v477_v41 = vadd.f32 %v476_v7, %v2104_v4  ;;  %v480_v63 = vadd.f32 %v479_v35, %v2104_v4 }
  0xd0   : > { %v2063_v51 = vpop.f32.mrf.mxu0  ;;  %v447_v52 = vpop.f32.mrf.mxu2 }
  0xd1   : > { %v2072_v55 = vadd.f32 %v447_v52, %v1977_v23 }
  0xd3   : > { %2314 = vst [vmem:[#allocation6_spill] sm:$0xff] %v2072_v55  ;;  %673 = vmatmul.f32.gmra.mxu3 %v2066_v53  ;;  %735 = vmatmul.f32.gmra.mxu0 %v2054_v49 }
  0xd5   : > { %1244 = vmatmul.msk.f32.gmra.mxu2 %vm339_vm0, %v1875_v6  ;;  %v471_v6 = vadd.f32 %v470_v57, %v2104_v4  ;;  %v2119_v57 = vpop.f32.mrf.mxu3 }
  0xd8   : > { %v2087_v60 = vpop.f32.mrf.mxu0  ;;  %v450_v61 = vpop.f32.mrf.mxu2 }
  0xd9   : > { %v2096_v0 = vadd.f32 %v450_v61, %v1977_v23 }
  0xdb   : > { %2315 = vst [vmem:[#allocation7_spill] sm:$0xff] %v2096_v0  ;;  %676 = vmatmul.f32.gmra.mxu3 %v2090_v62  ;;  %738 = vmatmul.f32.gmra.mxu0 %v2066_v53 }
  0xdd   : > { %741 = vmatmul.f32.vlgmr.msra.gmra.mxu2 %v2090_v62 }
  0xe0   : > { %v429_v2 = vpop.f32.mrf.mxu0  ;;  %v2101_v3 = vpop.f32.mrf.mxu2 }
  0xe1   : > { %v2107_v5 = vadd.f32 %v429_v2, %v1977_v23 }
  0xe8   : > { %v2110_v16 = vpop.f32.mrf.mxu2  ;;  %v697_v18 = vpop.f32.mrf.mxu0 }
  0xe9   : > { %v761_v22 = vadd.f32 %v697_v18, %v471_v6 }
  0xeb   : > { %v841_v24 = vmul.f32 0.5, %v761_v22 }
  0xed   : > { %1324 = vtanh.f32 %v841_v24 }
  0xf0   : > { %v2113_v19 = vpop.f32.mrf.mxu2  ;;  %v700_v29 = vpop.f32.mrf.mxu0 }
  0xf1   : > { %v762_v31 = vadd.f32 %v700_v29, %v474_v26  ;;  %v497_v29 = vpop.f32.mrf.mxu3 }
  0xf3   : > { %v1325_v32 = vpop.eup %1324  ;;  %v842_v37 = vmul.f32 0.5, %v762_v31  ;;  %v483_v31 = vadd.f32 %v482_v59, %v2104_v4 }
  0xf4   : > { %v873_v40 = vadd.f32 1.0, %v1325_v32  ;;  %v485_v32 = vpop.f32.mrf.mxu1 }
  0xf5   : > { %1326 = vtanh.f32 %v842_v37 }
  0xf6   : > { %v889_v43 = vmul.f32 0.5, %v873_v40 }
  0xf8   : > { %v2116_v46 = vpop.f32.mrf.mxu2  ;;  %v703_v48 = vpop.f32.mrf.mxu0  ;;  %v905_v52 = vmul.f32 %v889_v43, %v1899_v8 }
  0xf9   : > { %v763_v54 = vadd.f32 %v703_v48, %v477_v41 }
  0xfa   : > { %953 = vmatmul.f32.vlgmr.msrb.gmra.mxu1 %v905_v52 }
  0xfb   : > { %v1327_v56 = vpop.eup %1326  ;;  %v843_v58 = vmul.f32 0.5, %v763_v54 }
  0xfc   : > { %v874_v61 = vadd.f32 1.0, %v1327_v56  ;;  %v486_v56 = vadd.f32 %v485_v32, %v2104_v4 }
  0xfd   : > { %1328 = vtanh.f32 %v843_v58 }
  0xfe   : > { %v890_v1 = vmul.f32 0.5, %v874_v61  ;;  %v500_v61 = vpop.f32.mrf.mxu3 }
 0x100   : > { %v2122_v2 = vpop.f32.mrf.mxu2  ;;  %v706_v6 = vpop.f32.mrf.mxu0  ;;  %v906_v7 = vmul.f32 %v890_v1, %v1908_v9 }
 0x101   : > { %v764_v18 = vadd.f32 %v706_v6, %v480_v63  ;;  %v488_v63 = vpop.f32.mrf.mxu1 }
 0x102   : > { %956 = vmatmul.f32.gmra.mxu1 %v906_v7 }
 0x103   : > { %v1329_v22 = vpop.eup %1328  ;;  %v844_v24 = vmul.f32 0.5, %v764_v18 }
 0x104   : > { %v875_v26 = vadd.f32 1.0, %v1329_v22 }
 0x105   : > { %1330 = vtanh.f32 %v844_v24 }
 0x106   : > { %v891_v37 = vmul.f32 0.5, %v875_v26  ;;  %v489_v26 = vadd.f32 %v488_v63, %v2104_v4 }
 0x108   : > { %v2126_v40 = vpop.f32.mrf.mxu2  ;;  %v709_v35 = vpop.f32.mrf.mxu0  ;;  %v907_v41 = vmul.f32 %v891_v37, %v1915_v10 }
 0x109   : > { %v765_v43 = vadd.f32 %v709_v35, %v483_v31 }
 0x10a   : > { %959 = vmatmul.f32.gmra.mxu1 %v907_v41  ;;  %v503_v41 = vpop.f32.mrf.mxu3 }
 0x10b   : > { %v1331_v48 = vpop.eup %1330  ;;  %v845_v52 = vmul.f32 0.5, %v765_v43 }
 0x10c   : > { %v876_v54 = vadd.f32 1.0, %v1331_v48  ;;  %v491_v48 = vpop.f32.mrf.mxu1 }
 0x10d   : > { %1332 = vtanh.f32 %v845_v52 }
 0x10e   : > { %v892_v58 = vmul.f32 0.5, %v876_v54 }
 0x110   : > { %v2130_v1 = vpop.f32.mrf.mxu2  ;;  %v712_v59 = vpop.f32.mrf.mxu0  ;;  %v908_v6 = vmul.f32 %v892_v58, %v1922_v11  ;;  %v492_v58 = vadd.f32 %v491_v48, %v2104_v4 }
 0x111   : > { %v766_v7 = vadd.f32 %v712_v59, %v486_v56 }
 0x112   : > { %962 = vmatmul.f32.gmra.mxu1 %v908_v6 }
 0x113   : > { %v1333_v18 = vpop.eup %1332  ;;  %v846_v22 = vmul.f32 0.5, %v766_v7 }
 0x114   : > { %v877_v24 = vadd.f32 1.0, %v1333_v18 }
 0x115   : > { %1334 = vtanh.f32 %v846_v22 }
 0x116   : > { %v893_v31 = vmul.f32 0.5, %v877_v24  ;;  %v506_v24 = vpop.f32.mrf.mxu3 }
 0x118   : > { %v2134_v37 = vpop.f32.mrf.mxu2  ;;  %v715_v32 = vpop.f32.mrf.mxu0  ;;  %v909_v35 = vmul.f32 %v893_v31, %v1929_v12 }
 0x119   : > { %v767_v43 = vadd.f32 %v715_v32, %v489_v26  ;;  %v495_v32 = vadd.f32 %v2119_v57, %v2104_v4 }
 0x11a   : > { %965 = vmatmul.f32.gmra.mxu1 %v909_v35 }
 0x11b   : > { %v1335_v52 = vpop.eup %1334  ;;  %v847_v54 = vmul.f32 0.5, %v767_v43 }
 0x11c   : > { %v878_v56 = vadd.f32 1.0, %v1335_v52 }
 0x11d   : > { %1336 = vtanh.f32 %v847_v54 }
 0x11e   : > { %v894_v59 = vmul.f32 0.5, %v878_v56 }
 0x120   : > { %v2138_v6 = vpop.f32.mrf.mxu2  ;;  %v718_v63 = vpop.f32.mrf.mxu0  ;;  %v910_v7 = vmul.f32 %v894_v59, %v1935_v13 }
 0x121   : > { %v768_v18 = vadd.f32 %v718_v63, %v492_v58  ;;  %v498_v63 = vadd.f32 %v497_v29, %v2104_v4 }
 0x122   : > { %968 = vmatmul.f32.gmra.mxu1 %v910_v7  ;;  %v509_v7 = vpop.f32.mrf.mxu3 }
 0x123   : > { %v1337_v22 = vpop.eup %1336  ;;  %v848_v31 = vmul.f32 0.5, %v768_v18 }
 0x124   : > { %v879_v26 = vadd.f32 1.0, %v1337_v22 }
 0x125   : > { %1338 = vtanh.f32 %v848_v31 }
 0x126   : > { %v895_v35 = vmul.f32 0.5, %v879_v26 }
 0x128   : > { %v2143_v43 = vpop.f32.mrf.mxu2  ;;  %v721_v48 = vpop.f32.mrf.mxu0  ;;  %v911_v52 = vmul.f32 %v895_v35, %v1941_v14 }
 0x129   : > { %v769_v54 = vadd.f32 %v721_v48, %v495_v32  ;;  %v501_v32 = vadd.f32 %v500_v61, %v2104_v4 }
 0x12a   : > { %971 = vmatmul.f32.gmra.mxu1 %v911_v52  ;;  %v512_v52 = vpop.f32.mrf.mxu3 }
 0x12b   : > { %v1339_v56 = vpop.eup %1338  ;;  %v849_v59 = vmul.f32 0.5, %v769_v54 }
 0x12c   : > { %v880_v58 = vadd.f32 1.0, %v1339_v56 }
 0x12d   : > { %1340 = vtanh.f32 %v849_v59 }
 0x12e   : > { %v896_v18 = vmul.f32 0.5, %v880_v58 }
 0x130   : > { %v2147_v22 = vpop.f32.mrf.mxu2  ;;  %v724_v57 = vpop.f32.mrf.mxu0  ;;  %v912_v31 = vmul.f32 %v896_v18, %v1947_v15 }
 0x131   : > { %v770_v26 = vadd.f32 %v724_v57, %v498_v63  ;;  %v504_v63 = vadd.f32 %v503_v41, %v2104_v4 }
 0x132   : > { %974 = vmatmul.f32.gmra.mxu1 %v912_v31  ;;  %v515_v31 = vpop.f32.mrf.mxu3 }
 0x133   : > { %v1341_v0 = vpop.eup %1340  ;;  %v850_v55 = vmul.f32 0.5, %v770_v26 }
 0x134   : > { %v881_v35 = vadd.f32 1.0, %v1341_v0 }
 0x135   : > { %1342 = vtanh.f32 %v850_v55 }
 0x136   : > { %v897_v48 = vmul.f32 0.5, %v881_v35 }
 0x138   : > { %v2151_v54 = vpop.f32.mrf.mxu2  ;;  %v727_v29 = vpop.f32.mrf.mxu0  ;;  %v913_v56 = vmul.f32 %v897_v48, %v1962_v21 }
 0x139   : > { %2316 = vst [vmem:[#allocation8_spill] sm:$0xff] %v2151_v54  ;;  %v771_v59 = vadd.f32 %v727_v29, %v501_v32  ;;  %v507_v32 = vadd.f32 %v506_v24, %v2104_v4 }
 0x13a   : > { %977 = vmatmul.f32.gmra.mxu1 %v913_v56 }
 0x13b   : > { %v1343_v58 = vpop.eup %1342  ;;  %v851_v50 = vmul.f32 0.5, %v771_v59 }
 0x13c   : > { %v882_v18 = vadd.f32 1.0, %v1343_v58 }
 0x13d   : > { %1344 = vtanh.f32 %v851_v50 }
 0x13e   : > { %v898_v57 = vmul.f32 0.5, %v882_v18  ;;  %v632_v18 = vpop.f32.mrf.mxu3 }
 0x140   : > { %v2155_v0 = vpop.f32.mrf.mxu2  ;;  %v730_v61 = vpop.f32.mrf.mxu0  ;;  %v914_v55 = vmul.f32 %v898_v57, %v1985_v27 }
 0x141   : > { %2317 = vst [vmem:[#allocation9_spill] sm:$0xff] %v2155_v0  ;;  %v772_v26 = vadd.f32 %v730_v61, %v504_v63  ;;  %v510_v63 = vadd.f32 %v509_v7, %v2104_v4 }
 0x142   : > { %980 = vmatmul.f32.gmra.mxu1 %v914_v55 }
 0x143   : > { %v1345_v35 = vpop.eup %1344  ;;  %v852_v54 = vmul.f32 0.5, %v772_v26 }
 0x144   : > { %v883_v48 = vadd.f32 1.0, %v1345_v35 }
 0x145   : > { %1346 = vtanh.f32 %v852_v54 }
 0x146   : > { %v899_v29 = vmul.f32 0.5, %v883_v48 }
 0x148   : > { %v2159_v56 = vpop.f32.mrf.mxu2  ;;  %v733_v41 = vpop.f32.mrf.mxu0  ;;  %v915_v50 = vmul.f32 %v899_v29, %v2003_v33 }
 0x149   : > { %v773_v59 = vadd.f32 %v733_v41, %v507_v32  ;;  %v513_v32 = vadd.f32 %v512_v52, %v2104_v4  ;;  %v635_v41 = vpop.f32.mrf.mxu3 }
 0x14a   : > { %983 = vmatmul.f32.gmra.mxu1 %v915_v50 }
 0x14b   : > { %v1347_v58 = vpop.eup %1346  ;;  %v853_v57 = vmul.f32 0.5, %v773_v59 }
 0x14c   : > { %v884_v0 = vadd.f32 1.0, %v1347_v58 }
 0x14d   : > { %1348 = vtanh.f32 %v853_v57 }
 0x14e   : > { %v900_v61 = vmul.f32 0.5, %v884_v0 }
 0x150   : > { %v2163_v55 = vpop.f32.mrf.mxu2  ;;  %v736_v24 = vpop.f32.mrf.mxu0  ;;  %v916_v54 = vmul.f32 %v900_v61, %v2021_v38 }
 0x151   : > { %2318 = vst [vmem:[#allocation10_spill] sm:$0xff] %v2163_v55  ;;  %v774_v26 = vadd.f32 %v736_v24, %v510_v63  ;;  %v516_v63 = vadd.f32 %v515_v31, %v2104_v4 }
 0x152   : > { %986 = vmatmul.f32.gmra.mxu1 %v916_v54  ;;  %v638_v54 = vpop.f32.mrf.mxu3 }
 0x153   : > { %v1349_v35 = vpop.eup %1348  ;;  %v854_v48 = vmul.f32 0.5, %v774_v26 }
 0x154   : > { %v885_v29 = vadd.f32 1.0, %v1349_v35 }
 0x155   : > { %1350 = vtanh.f32 %v854_v48 }
 0x156   : > { %v901_v50 = vmul.f32 0.5, %v885_v29 }
 0x158   : > { %v2167_v59 = vpop.f32.mrf.mxu2  ;;  %v739_v7 = vpop.f32.mrf.mxu0  ;;  %v917_v0 = vmul.f32 %v901_v50, %v2039_v44 }
 0x159   : > { %2319 = vst [vmem:[#allocation11_spill] sm:$0xff] %v2167_v59  ;;  %v775_v58 = vadd.f32 %v739_v7, %v513_v32 }
 0x15a   : > { %989 = vmatmul.f32.gmra.mxu1 %v917_v0  ;;  %v641_v7 = vpop.f32.mrf.mxu3  ;;  %v406_v0 = vadd.f32 %v1959_v20, %v1977_v23 }
 0x15b   : > { %v1351_v57 = vpop.eup %1350  ;;  %v855_v55 = vmul.f32 0.5, %v775_v58 }
 0x15c   : > { %v886_v61 = vadd.f32 1.0, %v1351_v57  ;;  %v745_v31 = vadd.f32 %v632_v18, %v406_v0 }
 0x15d   : > { %1352 = vtanh.f32 %v855_v55 }
 0x15e   : > { %v902_v24 = vmul.f32 0.5, %v886_v61  ;;  %v777_v57 = vmul.f32 0.5, %v745_v31 }
 0x160   : > { %v742_v26 = vpop.f32.mrf.mxu2  ;;  %v918_v52 = vmul.f32 %v902_v24, %v2054_v49  ;;  %v2179_v24 = vperm.slane %v1972_v17, 2 }
 0x161   : > { %v776_v35 = vadd.f32 %v742_v26, %v516_v63  ;;  %v409_v63 = vadd.f32 %v1982_v25, %v1977_v23 }
 0x162   : > { %992 = vmatmul.f32.gmra.mxu1 %v918_v52  ;;  %v536_v20 = vadd.f32 %v2101_v3, %v2179_v24 }
 0x163   : > { %v1353_v48 = vpop.eup %1352  ;;  %v856_v29 = vmul.f32 0.5, %v776_v35  ;;  %v746_v26 = vadd.f32 %v635_v41, %v409_v63  ;;  %v542_v63 = vadd.f32 %v2113_v19, %v2179_v24 }
 0x164   : > { %v887_v59 = vadd.f32 1.0, %v1353_v48 }
 0x165   : > { %1354 = vtanh.f32 %v856_v29  ;;  %v778_v52 = vmul.f32 0.5, %v746_v26  ;;  %v412_v29 = vadd.f32 %v2000_v30, %v1977_v23  ;;  %v415_v30 = vadd.f32 %v2018_v36, %v1977_v23 }
 0x166   : > { %v903_v50 = vmul.f32 0.5, %v887_v59  ;;  %v644_v59 = vpop.f32.mrf.mxu3  ;;  %1356 = vtanh.f32 %v777_v57 }
 0x167   : > { %v747_v17 = vadd.f32 %v638_v54, %v412_v29  ;;  %v748_v57 = vadd.f32 %v641_v7, %v415_v30  ;;  %v418_v7 = vadd.f32 %v2036_v42, %v1977_v23 }
 0x168   : > { %v919_v32 = vmul.f32 %v903_v50, %v2066_v53 }
 0x169   : > { %v779_v3 = vmul.f32 0.5, %v747_v17  ;;  %v749_v19 = vadd.f32 %v644_v59, %v418_v7 }
 0x16a   : > { %995 = vmatmul.f32.gmra.mxu1 %v919_v32  ;;  %v539_v32 = vadd.f32 %v2110_v16, %v2179_v24 }
 0x16b   : > { %v1355_v4 = vpop.eup %1354 }
 0x16c   : > { %v888_v55 = vadd.f32 1.0, %v1355_v4  ;;  %v1357_v48 = vpop.eup %1356 }
 0x16d   : > { %v809_v25 = vadd.f32 1.0, %v1357_v48 }
 0x16e   : > { %v904_v58 = vmul.f32 0.5, %v888_v55  ;;  %v647_v50 = vpop.f32.mrf.mxu3 }
 0x16f   : > { %v825_v31 = vmul.f32 0.5, %v809_v25 }
 0x170   : > { %v920_v61 = vmul.f32 %v904_v58, %v2090_v62 }
 0x172   : > { %998 = vmatmul.f32.gmra.mxu1 %v920_v61 }
 0x176   : > { %v650_v26 = vpop.f32.mrf.mxu3 }
 0x177   : > { %v954_v18 = vpop.f32.mrf.mxu1 }
 0x178   : > { %v1002_v35 = vadd.f32 %v954_v18, %v536_v20  ;;  %v780_v18 = vmul.f32 0.5, %v748_v57  ;;  %v548_v57 = vadd.f32 %v2122_v2, %v2179_v24 }
 0x17a   : > { %1358 = vtanh.f32 %v1002_v35 }
 0x17b   : > { %1360 = vtanh.f32 %v778_v52 }
 0x17f   : > { %v957_v41 = vpop.f32.mrf.mxu1 }
 0x180   : > { %v1359_v0 = vpop.eup %1358  ;;  %v1003_v4 = vadd.f32 %v957_v41, %v539_v32  ;;  %v545_v32 = vadd.f32 %v2116_v46, %v2179_v24 }
 0x181   : > { %v1034_v55 = vsub.f32 %v1899_v8, %v1359_v0  ;;  %v1361_v58 = vpop.eup %1360 }
 0x182   : > { %1362 = vtanh.f32 %v1003_v4  ;;  %v810_v61 = vadd.f32 1.0, %v1361_v58  ;;  %v421_v58 = vadd.f32 %v2051_v47, %v1977_v23  ;;  %v424_v47 = vadd.f32 %v2063_v51, %v1977_v23 }
 0x183   : > { %v1050_v54 = vmul.f32 %v1034_v55, %v825_v31  ;;  %1364 = vtanh.f32 %v779_v3  ;;  %v781_v3 = vmul.f32 0.5, %v749_v19  ;;  %v653_v31 = vpop.f32.mrf.mxu3 }
 0x184   : > { %v826_v36 = vmul.f32 0.5, %v810_v61  ;;  %v750_v30 = vadd.f32 %v647_v50, %v421_v58 }
 0x185   : > { %v1066_v16 = vadd.f32 %v1359_v0, %v1050_v54 }
 0x187   : > { %1082 = vst [vmem:[%s2195_s28] sm:$0xff] %v1066_v16  ;;  %v960_v8 = vpop.f32.mrf.mxu1 }
 0x188   : > { %v1363_v20 = vpop.eup %1362  ;;  %v1004_v52 = vadd.f32 %v960_v8, %v542_v63  ;;  %v782_v63 = vmul.f32 0.5, %v750_v30 }
 0x189   : > { %v1035_v35 = vsub.f32 %v1908_v9, %v1363_v20  ;;  %v1365_v48 = vpop.eup %1364 }
 0x18a   : > { %1366 = vtanh.f32 %v1004_v52  ;;  %v811_v17 = vadd.f32 1.0, %v1365_v48  ;;  %v551_v48 = vadd.f32 %v2126_v40, %v2179_v24 }
 0x18b   : > { %v1051_v29 = vmul.f32 %v1035_v35, %v826_v36  ;;  %1368 = vtanh.f32 %v780_v18  ;;  %v656_v50 = vpop.f32.mrf.mxu3  ;;  %v751_v36 = vadd.f32 %v650_v26, %v424_v47 }
 0x18c   : > { %v827_v9 = vmul.f32 0.5, %v811_v17 }
 0x18d   : > { %v1067_v25 = vadd.f32 %v1363_v20, %v1051_v29  ;;  %v783_v19 = vmul.f32 0.5, %v751_v36 }
 0x18f   : > { %1083 = vst [vmem:[%s2195_s28 + $0x8] sm:$0xff] %v1067_v25  ;;  %v963_v41 = vpop.f32.mrf.mxu1 }
 0x190   : > { %v1367_v0 = vpop.eup %1366  ;;  %v1005_v4 = vadd.f32 %v963_v41, %v545_v32  ;;  %v427_v32 = vadd.f32 %v2087_v60, %v1977_v23 }
 0x191   : > { %v1036_v55 = vsub.f32 %v1915_v10, %v1367_v0  ;;  %v1369_v42 = vpop.eup %1368 }
 0x192   : > { %1370 = vtanh.f32 %v1005_v4  ;;  %v812_v54 = vadd.f32 1.0, %v1369_v42  ;;  %v752_v41 = vadd.f32 %v653_v31, %v427_v32  ;;  %v554_v4 = vadd.f32 %v2130_v1, %v2179_v24 }
 0x193   : > { %v1052_v59 = vmul.f32 %v1036_v55, %v827_v9  ;;  %1372 = vtanh.f32 %v781_v3  ;;  %v659_v3 = vpop.f32.mrf.mxu3  ;;  %v753_v31 = vadd.f32 %v656_v50, %v2107_v5  ;;  %v557_v1 = vadd.f32 %v2134_v37, %v2179_v24 }
 0x194   : > { %v828_v10 = vmul.f32 0.5, %v812_v54  ;;  %v784_v42 = vmul.f32 0.5, %v752_v41  ;;  %v754_v5 = vadd.f32 %v659_v3, %v1988_v28  ;;  %v560_v37 = vadd.f32 %v2138_v6, %v2179_v24 }
 0x195   : > { %v1068_v46 = vadd.f32 %v1367_v0, %v1052_v59  ;;  %v563_v6 = vadd.f32 %v2143_v43, %v2179_v24  ;;  %v566_v43 = vadd.f32 %v2147_v22, %v2179_v24  ;;  %v2320_v22 = vld [vmem:[#allocation8_spill] sm:$0xff] }
 0x196   : > { %v786_v36 = vmul.f32 0.5, %v754_v5  ;;  %v2322_v5 = vld [vmem:[#allocation9_spill] sm:$0xff] }
 0x197   : > { %1084 = vst [vmem:[%s2195_s28 + $0x10] sm:$0xff] %v1068_v46  ;;  %v966_v61 = vpop.f32.mrf.mxu1 }
 0x198   : > { %v1371_v16 = vpop.eup %1370  ;;  %v1006_v8 = vadd.f32 %v966_v61, %v548_v57 }
 0x199   : > { %v1037_v20 = vsub.f32 %v1922_v11, %v1371_v16  ;;  %v1373_v18 = vpop.eup %1372 }
 0x19a   : > { %1374 = vtanh.f32 %v1006_v8  ;;  %v813_v35 = vadd.f32 1.0, %v1373_v18 }
 0x19b   : > { %v1053_v52 = vmul.f32 %v1037_v20, %v828_v10  ;;  %1376 = vtanh.f32 %v782_v63  ;;  %v662_v46 = vpop.f32.mrf.mxu3 }
 0x19c   : > { %v829_v17 = vmul.f32 0.5, %v813_v35  ;;  %v755_v28 = vadd.f32 %v662_v46, %v2006_v34 }
 0x19d   : > { %v1069_v2 = vadd.f32 %v1371_v16, %v1053_v52  ;;  %v785_v16 = vmul.f32 0.5, %v753_v31 }
 0x19f   : > { %1085 = vst [vmem:[%s2195_s28 + $0x18] sm:$0xff] %v1069_v2  ;;  %v969_v7 = vpop.f32.mrf.mxu1 }
 0x1a0   : > { %v1375_v29 = vpop.eup %1374  ;;  %v1007_v11 = vadd.f32 %v969_v7, %v551_v48 }
 0x1a1   : > { %v1038_v25 = vsub.f32 %v1929_v12, %v1375_v29  ;;  %v1377_v51 = vpop.eup %1376 }
 0x1a2   : > { %1378 = vtanh.f32 %v1007_v11  ;;  %v814_v0 = vadd.f32 1.0, %v1377_v51  ;;  %v787_v51 = vmul.f32 0.5, %v755_v28 }
 0x1a3   : > { %v1054_v26 = vmul.f32 %v1038_v25, %v829_v17  ;;  %1380 = vtanh.f32 %v783_v19  ;;  %v665_v48 = vpop.f32.mrf.mxu3 }
 0x1a4   : > { %v830_v58 = vmul.f32 0.5, %v814_v0  ;;  %v756_v34 = vadd.f32 %v665_v48, %v2024_v39 }
 0x1a5   : > { %v1070_v40 = vadd.f32 %v1375_v29, %v1054_v26 }
 0x1a7   : > { %1086 = vst [vmem:[%s2195_s28 + $0x20] sm:$0xff] %v1070_v40  ;;  %v972_v9 = vpop.f32.mrf.mxu1 }
 0x1a8   : > { %v1379_v55 = vpop.eup %1378  ;;  %v1008_v12 = vadd.f32 %v972_v9, %v554_v4 }
 0x1a9   : > { %v1039_v59 = vsub.f32 %v1935_v13, %v1379_v55  ;;  %v1381_v23 = vpop.eup %1380 }
 0x1aa   : > { %1382 = vtanh.f32 %v1008_v12  ;;  %v815_v30 = vadd.f32 1.0, %v1381_v23 }
 0x1ab   : > { %v1055_v60 = vmul.f32 %v1039_v59, %v830_v58  ;;  %1384 = vtanh.f32 %v784_v42  ;;  %v668_v0 = vpop.f32.mrf.mxu3  ;;  %v788_v42 = vmul.f32 0.5, %v756_v34 }
 0x1ac   : > { %v831_v8 = vmul.f32 0.5, %v815_v30  ;;  %v757_v39 = vadd.f32 %v668_v0, %v2042_v45  ;;  %v2321_v45 = vld [vmem:[#allocation5_spill] sm:$0xff] }
 0x1ad   : > { %v1071_v54 = vadd.f32 %v1379_v55, %v1055_v60 }
 0x1af   : > { %1087 = vst [vmem:[%s2195_s28 + $0x28] sm:$0xff] %v1071_v54  ;;  %v975_v57 = vpop.f32.mrf.mxu1  ;;  %v569_v54 = vadd.f32 %v2320_v22, %v2179_v24 }
 0x1b0   : > { %v1383_v61 = vpop.eup %1382  ;;  %v1009_v63 = vadd.f32 %v975_v57, %v557_v1  ;;  %v789_v57 = vmul.f32 0.5, %v757_v39 }
 0x1b1   : > { %v1040_v13 = vsub.f32 %v1941_v14, %v1383_v61  ;;  %v1385_v10 = vpop.eup %1384 }
 0x1b2   : > { %1386 = vtanh.f32 %v1009_v63  ;;  %v816_v18 = vadd.f32 1.0, %v1385_v10 }
 0x1b3   : > { %v1056_v20 = vmul.f32 %v1040_v13, %v831_v8  ;;  %1388 = vtanh.f32 %v785_v16  ;;  %v671_v31 = vpop.f32.mrf.mxu3 }
 0x1b4   : > { %v832_v2 = vmul.f32 0.5, %v816_v18  ;;  %v758_v13 = vadd.f32 %v671_v31, %v2321_v45  ;;  %v572_v18 = vadd.f32 %v2322_v5, %v2179_v24 }
 0x1b5   : > { %v1072_v47 = vadd.f32 %v1383_v61, %v1056_v20 }
 0x1b7   : > { %1088 = vst [vmem:[%s2195_s28 + $0x30] sm:$0xff] %v1072_v47  ;;  %v978_v50 = vpop.f32.mrf.mxu1 }
 0x1b8   : > { %v1387_v52 = vpop.eup %1386  ;;  %v1010_v35 = vadd.f32 %v978_v50, %v560_v37 }
 0x1b9   : > { %v1041_v14 = vsub.f32 %v1947_v15, %v1387_v52  ;;  %v1389_v7 = vpop.eup %1388 }
 0x1ba   : > { %1390 = vtanh.f32 %v1010_v35  ;;  %v817_v19 = vadd.f32 1.0, %v1389_v7 }
 0x1bb   : > { %v1057_v29 = vmul.f32 %v1041_v14, %v832_v2  ;;  %1392 = vtanh.f32 %v786_v36  ;;  %v674_v47 = vpop.f32.mrf.mxu3  ;;  %v2323_v14 = vld [vmem:[#allocation6_spill] sm:$0xff] }
 0x1bc   : > { %v833_v26 = vmul.f32 0.5, %v817_v19  ;;  %v759_v7 = vadd.f32 %v674_v47, %v2323_v14  ;;  %v575_v19 = vadd.f32 %v2159_v56, %v2179_v24  ;;  %v2325_v56 = vld [vmem:[#allocation10_spill] sm:$0xff] }
 0x1bd   : > { %v1073_v11 = vadd.f32 %v1387_v52, %v1057_v29  ;;  %v790_v52 = vmul.f32 0.5, %v758_v13 }
 0x1bf   : > { %1089 = vst [vmem:[%s2195_s28 + $0x38] sm:$0xff] %v1073_v11  ;;  %v981_v17 = vpop.f32.mrf.mxu1 }
 0x1c0   : > { %v1391_v25 = vpop.eup %1390  ;;  %v1011_v32 = vadd.f32 %v981_v17, %v563_v6  ;;  %v791_v17 = vmul.f32 0.5, %v759_v7 }
 0x1c1   : > { %v1042_v15 = vsub.f32 %v1962_v21, %v1391_v25  ;;  %v1393_v41 = vpop.eup %1392 }
 0x1c2   : > { %1394 = vtanh.f32 %v1011_v32  ;;  %v818_v40 = vadd.f32 1.0, %v1393_v41  ;;  %v2324_v41 = vld [vmem:[#allocation7_spill] sm:$0xff] }
 0x1c3   : > { %v1058_v3 = vmul.f32 %v1042_v15, %v833_v26  ;;  %1396 = vtanh.f32 %v787_v51  ;;  %v677_v32 = vpop.f32.mrf.mxu3 }
 0x1c4   : > { %v834_v58 = vmul.f32 0.5, %v818_v40  ;;  %v760_v0 = vadd.f32 %v677_v32, %v2324_v41  ;;  %v578_v40 = vadd.f32 %v2325_v56, %v2179_v24 }
 0x1c5   : > { %v1074_v4 = vadd.f32 %v1391_v25, %v1058_v3 }
 0x1c7   : > { %1090 = vst [vmem:[%s2195_s28 + $0x40] sm:$0xff] %v1074_v4  ;;  %v984_v9 = vpop.f32.mrf.mxu1 }
 0x1c8   : > { %v1395_v55 = vpop.eup %1394  ;;  %v1012_v12 = vadd.f32 %v984_v9, %v566_v43  ;;  %v792_v9 = vmul.f32 0.5, %v760_v0 }
 0x1c9   : > { %v1043_v21 = vsub.f32 %v1985_v27, %v1395_v55  ;;  %v1397_v59 = vpop.eup %1396 }
 0x1ca   : > { %1398 = vtanh.f32 %v1012_v12  ;;  %v819_v60 = vadd.f32 1.0, %v1397_v59 }
 0x1cb   : > { %v1059_v23 = vmul.f32 %v1043_v21, %v834_v58  ;;  %1400 = vtanh.f32 %v788_v42 }
 0x1cc   : > { %v835_v16 = vmul.f32 0.5, %v819_v60 }
 0x1cd   : > { %v1075_v30 = vadd.f32 %v1395_v55, %v1059_v23  ;;  %v2326_v23 = vld [vmem:[#allocation11_spill] sm:$0xff] }
 0x1ce   : > { %v581_v39 = vadd.f32 %v2326_v23, %v2179_v24 }
 0x1cf   : > { %1091 = vst [vmem:[%s2195_s28 + $0x48] sm:$0xff] %v1075_v30  ;;  %v987_v1 = vpop.f32.mrf.mxu1 }
 0x1d0   : > { %v1399_v46 = vpop.eup %1398  ;;  %v1013_v61 = vadd.f32 %v987_v1, %v569_v54 }
 0x1d1   : > { %v1044_v27 = vsub.f32 %v2003_v33, %v1399_v46  ;;  %v1401_v63 = vpop.eup %1400 }
 0x1d2   : > { %1402 = vtanh.f32 %v1013_v61  ;;  %v820_v10 = vadd.f32 1.0, %v1401_v63 }
 0x1d3   : > { %v1060_v8 = vmul.f32 %v1044_v27, %v835_v16  ;;  %1404 = vtanh.f32 %v789_v57 }
 0x1d4   : > { %v836_v35 = vmul.f32 0.5, %v820_v10 }
 0x1d5   : > { %v1076_v20 = vadd.f32 %v1399_v46, %v1060_v8 }
 0x1d7   : > { %1092 = vst [vmem:[%s2195_s28 + $0x50] sm:$0xff] %v1076_v20  ;;  %v990_v37 = vpop.f32.mrf.mxu1 }
 0x1d8   : > { %v1403_v50 = vpop.eup %1402  ;;  %v1014_v36 = vadd.f32 %v990_v37, %v572_v18 }
 0x1d9   : > { %v1045_v33 = vsub.f32 %v2021_v38, %v1403_v50  ;;  %v1405_v2 = vpop.eup %1404 }
 0x1da   : > { %1406 = vtanh.f32 %v1014_v36  ;;  %v821_v29 = vadd.f32 1.0, %v1405_v2 }
 0x1db   : > { %v1061_v48 = vmul.f32 %v1045_v33, %v836_v35  ;;  %1408 = vtanh.f32 %v790_v52 }
 0x1dc   : > { %v837_v51 = vmul.f32 0.5, %v821_v29 }
 0x1dd   : > { %v1077_v28 = vadd.f32 %v1403_v50, %v1061_v48 }
 0x1df   : > { %1093 = vst [vmem:[%s2195_s28 + $0x58] sm:$0xff] %v1077_v28  ;;  %v993_v11 = vpop.f32.mrf.mxu1 }
 0x1e0   : > { %v1407_v6 = vpop.eup %1406  ;;  %v1015_v25 = vadd.f32 %v993_v11, %v575_v19 }
 0x1e1   : > { %v1046_v38 = vsub.f32 %v2039_v44, %v1407_v6  ;;  %v1409_v26 = vpop.eup %1408 }
 0x1e2   : > { %1410 = vtanh.f32 %v1015_v25  ;;  %v822_v3 = vadd.f32 1.0, %v1409_v26 }
 0x1e3   : > { %v1062_v15 = vmul.f32 %v1046_v38, %v837_v51  ;;  %1412 = vtanh.f32 %v791_v17 }
 0x1e4   : > { %v838_v42 = vmul.f32 0.5, %v822_v3 }
 0x1e5   : > { %v1078_v34 = vadd.f32 %v1407_v6, %v1062_v15 }
 0x1e7   : > { %1094 = vst [vmem:[%s2195_s28 + $0x60] sm:$0xff] %v1078_v34  ;;  %v996_v4 = vpop.f32.mrf.mxu1 }
 0x1e8   : > { %v1411_v43 = vpop.eup %1410  ;;  %v1016_v55 = vadd.f32 %v996_v4, %v578_v40 }
 0x1e9   : > { %v1047_v44 = vsub.f32 %v2054_v49, %v1411_v43  ;;  %v1413_v12 = vpop.eup %1412 }
 0x1ea   : > { %1414 = vtanh.f32 %v1016_v55  ;;  %v823_v21 = vadd.f32 1.0, %v1413_v12 }
 0x1eb   : > { %v1063_v58 = vmul.f32 %v1047_v44, %v838_v42  ;;  %1416 = vtanh.f32 %v792_v9 }
 0x1ec   : > { %v839_v22 = vmul.f32 0.5, %v823_v21 }
 0x1ed   : > { %v1079_v59 = vadd.f32 %v1411_v43, %v1063_v58 }
 0x1ef   : > { %1095 = vst [vmem:[%s2195_s28 + $0x68] sm:$0xff] %v1079_v59  ;;  %v999_v60 = vpop.f32.mrf.mxu1 }
 0x1f0   : > { %v1415_v31 = vpop.eup %1414  ;;  %v1017_v30 = vadd.f32 %v999_v60, %v581_v39 }
 0x1f1   : > { %v1048_v54 = vsub.f32 %v2066_v53, %v1415_v31  ;;  %v1417_v49 = vpop.eup %1416 }
 0x1f2   : > { %1418 = vtanh.f32 %v1017_v30  ;;  %v824_v46 = vadd.f32 1.0, %v1417_v49 }
 0x1f3   : > { %v1064_v1 = vmul.f32 %v1048_v54, %v839_v22 }
 0x1f4   : > { %v840_v61 = vmul.f32 0.5, %v824_v46 }
 0x1f5   : > { %v1080_v57 = vadd.f32 %v1415_v31, %v1064_v1 }
 0x1f7   : > { %1096 = vst [vmem:[%s2195_s28 + $0x70] sm:$0xff] %v1080_v57 }
 0x1f8   : > { %v1419_v24 = vpop.eup %1418 }
 0x1f9   : > { %v1049_v16 = vsub.f32 %v2090_v62, %v1419_v24 }
 0x1fb   : > { %v1065_v53 = vmul.f32 %v1049_v16, %v840_v61 }
 0x1fd   : > { %v1081_v27 = vadd.f32 %v1419_v24, %v1065_v53 }
 0x1ff   : > { %1097 = vst [vmem:[%s2195_s28 + $0x78] sm:$0xff] %v1081_v27 }
 0x200   : > { %1447 = shalt.err (!%p1444_p3)
}
 0x201   : > { %s1484_s17 = smov 128   ;;  %s1485_s28 = smov 8  }
 0x202   : > { %1283 = dma.vmem_to_hbm [thread:$0]  (%p1559_p5), %s1112_s13, 2048, %s1114_s14, %s1099_s25, %s1484_s17, %s1484_s17, %s1485_s28  }
 0x203 PF: > { %p1289_p4 = scmp.ge.s32.totalorder %s1482_s24, 2  ;;  %s1128_s29 = sand.u32 1, %s1470_s21  }
 0x204   : > { %s1129_s9 = scalar_lea.sflag [#allocation3], %s1128_s29 }
 0x205   : > { %p1286_p7 = pnand %p1289_p4, %p1563_p6 }
 0x207   : > { %p1287_p8 = pneg %p1286_p7 }
 0x209   : > { %1465 = dma.done.wait (%p1287_p8), %s1129_s9, 2048  }
 0x20a   : > { %1467 = vsyncadd (%p1287_p8), %s1129_s9, 4294965248  ;;  %p16_p9 = scmp.ge.s32.totalorder %s1546_s27, 4   ;;  %s2327_s21 = smov %s1474_s22 }
 0x20b   : > { %s2328_s22 = smov %s1478_s23  ;;  %s2329_s23 = smov %s1557_s30 }
 0x20c   : > { %s2330_s24 = smov %s1546_s27  ;;  %18 = sbr.rel (!%p16_p9) target bundleno = 3 (0x3), region = 82 }
 0x211   :  { %1135 = vsyncpa [#allocation3], 1 }
 0x212   :  { %1137 = vsyncpa [#allocation3 + $0x1], 1 }

</bundles_post_ra>
